<compile_context>
chip_gen: v7x
topology: tpu7x:2x2x1
jax: 0.10.0
libtpu: 0.0.40
codegen_flags: <defaults>
</compile_context>

<pallas_src>
import jax
import jax.numpy as jnp
from jax import lax
from jax.experimental import pallas as pl
from jax.experimental.pallas import tpu as pltpu

_LANE = 128
_SUBLANE = 8


def _round_up(v, m):
    return ((v + m - 1) // m) * m


# ---------------------------------------------------------------------------
# Kernel
# ---------------------------------------------------------------------------
def _periodic_embedding_kernel(x_ref, w_ref, b_ref, hid_ref, o_ref):
    """Fused forward for one batch tile.

    x_ref   : (block_b, D)   input rows
    w_ref   : (D, E)         column-packed [linear | linear2? | periodic | nonlinear]
    b_ref   : (1, E)         packed biases
    hid_ref : (1, E) int32   per-column head id: 0=linear, 1=periodic, 2=nonlinear
    o_ref   : (block_b, E)   output rows
    """
    # One MXU matmul covers every head; fp32 contraction so the sign() columns
    # are deterministic w.r.t. the high-precision reference.
    z = jnp.dot(x_ref[...], w_ref[...],
                preferred_element_type=jnp.float32,
                precision=lax.Precision.HIGHEST)
    z = z + b_ref[...]                       # (block_b, E) f32
    s = jnp.sin(z)
    # torch.sign semantics written as compare/select (robust Mosaic lowering).
    sgn = jnp.where(s > 0.0, 1.0, jnp.where(s < 0.0, -1.0, 0.0))
    hid = hid_ref[...]                       # (1, E) int32, broadcasts over rows
    out = jnp.where(hid == 0, z, jnp.where(hid == 1, s, sgn))
    o_ref[...] = out.astype(o_ref.dtype)


# ---------------------------------------------------------------------------
# Parameter packing (done once, at init time)
# ---------------------------------------------------------------------------
def pack_params(params, *, embed_dim, dtype=jnp.float32):
    """Pack all heads column-wise ONCE.  No lane padding: columns == embed_dim."""
    k = (embed_dim - 1) // 2
    n_lin = 2 if embed_dim % 2 == 0 else 1
    E = n_lin + 2 * k                        # == embed_dim

    w_cols = [params["w_lin"]]                           # (D, 1)
    b_cols = [params["b_lin"].reshape(1, 1)]             # (1, 1)
    if n_lin == 2:
        w_cols.append(params["w_lin2"])
        b_cols.append(params["b_lin2"].reshape(1, 1))
    w_cols += [params["periodic_weights"], params["nonlinear_weights"]]
    b_cols += [params["periodic_bias"], params["nonlinear_bias"]]

    w_packed = jnp.concatenate(w_cols, axis=1).astype(dtype)    # (D, E)
    b_packed = jnp.concatenate(b_cols, axis=1).astype(dtype)    # (1, E)
    head_id = jnp.concatenate(
        [jnp.zeros((n_lin,), jnp.int32),
         jnp.full((k,), 1, jnp.int32),
         jnp.full((k,), 2, jnp.int32)]).reshape(1, E)
    return w_packed, b_packed, head_id, E


# ---------------------------------------------------------------------------
# Wrapper
# ---------------------------------------------------------------------------
def periodic_embedding(x, packed, *, block_b=4096, out_dtype=jnp.float32):
    """Pallas implementation of PeriodicEmbedding.forward.

    `packed` is the tuple returned by pack_params (built once at init).
    """
    w_packed, b_packed, head_id, E = packed
    B, D = x.shape
    itemsize = lambda dt: jnp.dtype(dt).itemsize

    # --- real (8,128)-padded VMEM footprints (everything is double-buffered) ---
    fixed = 2 * (_round_up(D, _SUBLANE) * _round_up(E, _LANE) * itemsize(w_packed.dtype)
                 + _SUBLANE * _round_up(E, _LANE) * itemsize(b_packed.dtype)
                 + _SUBLANE * _round_up(E, _LANE) * itemsize(head_id.dtype))
    per_row = 2 * (_round_up(D, _LANE) * itemsize(x.dtype)
                   + _round_up(E, _LANE) * itemsize(out_dtype))
    budget = 24 * 1024 * 1024                 # comfortable even on v7x (64 MiB VMEM)
    max_rows = max(_SUBLANE, ((max(budget - fixed, per_row) // per_row)
                              // _SUBLANE) * _SUBLANE)

    # --- batch tile: large, multiple of 8, but keep >= 2 grid steps if possible
    # (lets the "parallel" axis shard across v7x's two TensorCores). ---
    if B <= _SUBLANE:
        block_b = B                           # full-dim block, no sublane constraint
    else:
        block_b = max(_SUBLANE, _round_up(min(block_b, max_rows, B), _SUBLANE))
        if pl.cdiv(B, block_b) < 2:
            block_b = max(_SUBLANE, _round_up(pl.cdiv(B, 2), _SUBLANE))

    grid = (pl.cdiv(B, block_b),)             # ragged last block: no pad/slice copies

    needed = fixed + block_b * per_row
    vmem_limit = int(min(max(needed * 3 // 2, 16 * 1024 * 1024), 32 * 1024 * 1024))

    return pl.pallas_call(
        _periodic_embedding_kernel,
        out_shape=jax.ShapeDtypeStruct((B, E), out_dtype),
        grid_spec=pl.GridSpec(
            grid=grid,
            in_specs=[
                pl.BlockSpec((block_b, D), lambda i: (i, 0)),   # x tile
                pl.BlockSpec((D, E), lambda i: (0, 0)),         # packed W (resident)
                pl.BlockSpec((1, E), lambda i: (0, 0)),         # packed bias
                pl.BlockSpec((1, E), lambda i: (0, 0)),         # head ids
            ],
            out_specs=pl.BlockSpec((block_b, E), lambda i: (i, 0)),
        ),
        compiler_params=pltpu.CompilerParams(
            dimension_semantics=("parallel",),
            vmem_limit_bytes=vmem_limit,
        ),
    )(x, w_packed, b_packed, head_id)


# ---------------------------------------------------------------------------
# Plain-JAX reference (mirrors the PyTorch forward exactly)
# ---------------------------------------------------------------------------
def periodic_embedding_ref(x, params, *, embed_dim):
    hp = lax.Precision.HIGHEST
    lin = jnp.dot(x, params["w_lin"], precision=hp) + params["b_lin"]
    per = jnp.sin(jnp.dot(x, params["periodic_weights"], precision=hp)
                  + params["periodic_bias"])
    non = jnp.sign(jnp.sin(jnp.dot(x, params["nonlinear_weights"], precision=hp)
                           + params["nonlinear_bias"]))
    if embed_dim % 2 == 0:
        lin2 = jnp.dot(x, params["w_lin2"], precision=hp) + params["b_lin2"]
        return jnp.concatenate([lin, lin2, per, non], axis=-1)
    return jnp.concatenate([lin, per, non], axis=-1)


def make_params(key, input_dim, embed_dim):
    k = (embed_dim - 1) // 2
    keys = jax.random.split(key, 8)
    params = {
        "w_lin": jax.random.normal(keys[0], (input_dim, 1), jnp.float32),
        "b_lin": jax.random.normal(keys[1], (1,), jnp.float32),
        "periodic_weights": jax.random.normal(keys[2], (input_dim, k), jnp.float32),
        "periodic_bias": jax.random.normal(keys[3], (1, k), jnp.float32),
        "nonlinear_weights": jax.random.normal(keys[4], (input_dim, k), jnp.float32),
        "nonlinear_bias": jax.random.normal(keys[5], (1, k), jnp.float32),
    }
    if embed_dim % 2 == 0:
        params["w_lin2"] = jax.random.normal(keys[6], (input_dim, 1), jnp.float32)
        params["b_lin2"] = jax.random.normal(keys[7], (1,), jnp.float32)
    return params


if __name__ == "__main__":
    key = jax.random.PRNGKey(0)

    # Case 1: even embed_dim (two linear heads), batch a multiple of 8.
    input_dim, embed_dim, batch = 4, 8, 16
    key, kp, kx = jax.random.split(key, 3)
    params = make_params(kp, input_dim, embed_dim)
    x = jax.random.normal(kx, (batch, input_dim), jnp.float32)
    packed = pack_params(params, embed_dim=embed_dim)          # once, at init
    out = jax.block_until_ready(periodic_embedding(x, packed))
    ref = periodic_embedding_ref(x, params, embed_dim=embed_dim)
    assert out.shape == (batch, embed_dim), out.shape
    assert jnp.allclose(out, ref, atol=1e-4, rtol=1e-4), "even-case mismatch"

    # Case 2: odd embed_dim (one linear head), ragged batch (not a tile multiple).
    input_dim, embed_dim, batch = 4, 7, 13
    key, kp, kx = jax.random.split(key, 3)
    params = make_params(kp, input_dim, embed_dim)
    x = jax.random.normal(kx, (batch, input_dim), jnp.float32)
    packed = pack_params(params, embed_dim=embed_dim)
    out = jax.block_until_ready(periodic_embedding(x, packed))
    ref = periodic_embedding_ref(x, params, embed_dim=embed_dim)
    assert out.shape == (batch, embed_dim), out.shape
    assert jnp.allclose(out, ref, atol=1e-4, rtol=1e-4), "odd-case mismatch"

    print("KERNEL_OK")
</pallas_src>

<mosaic_0001>
module attributes {stable_mosaic.version = 11 : i64} {
  func.func @_periodic_embedding_kernel(%arg0: i32, %arg1: memref<8x4xf32, #tpu.memory_space<vmem>>, %arg2: memref<4x8xf32, #tpu.memory_space<vmem>>, %arg3: memref<1x8xf32, #tpu.memory_space<vmem>>, %arg4: memref<1x8xi32, #tpu.memory_space<vmem>>, %arg5: memref<8x8xf32, #tpu.memory_space<vmem>>) attributes {dimension_semantics = [#tpu.dimension_semantics<parallel>], iteration_bounds = array<i64: 2>, scalar_prefetch = 0 : i64, scratch_operands = 0 : i64, tpu.core_type = #tpu.core_type<tc>, window_params = [{transform_indices = @transform_0, window_bounds = array<i64: 8, 4>}, {pipeline_mode = #tpu.pipeline_mode<synchronous>, transform_indices = @transform_1, window_bounds = array<i64: 4, 8>}, {pipeline_mode = #tpu.pipeline_mode<synchronous>, transform_indices = @transform_2, window_bounds = array<i64: 1, 8>}, {pipeline_mode = #tpu.pipeline_mode<synchronous>, transform_indices = @transform_3, window_bounds = array<i64: 1, 8>}, {transform_indices = @transform_4, window_bounds = array<i64: 8, 8>}]} {
    %c0 = arith.constant 0 : index
    %c0_0 = arith.constant 0 : index
    %0 = vector.load %arg1[%c0, %c0_0] : memref<8x4xf32, #tpu.memory_space<vmem>>, vector<8x4xf32>
    %c0_1 = arith.constant 0 : index
    %c0_2 = arith.constant 0 : index
    %1 = vector.load %arg2[%c0_1, %c0_2] : memref<4x8xf32, #tpu.memory_space<vmem>>, vector<4x8xf32>
    %cst = arith.constant dense<0.000000e+00> : vector<8x8xf32>
    %2 = tpu.matmul %0, %1, %cst {dimension_numbers = #tpu.dot_dimension_numbers<[1], [0], [0], [1], [0, 0, 1, 1], [], []>, precision = #tpu.contract_precision<fp32>} : vector<8x4xf32>, vector<4x8xf32>, vector<8x8xf32> -> vector<8x8xf32>
    %c0_3 = arith.constant 0 : index
    %c0_4 = arith.constant 0 : index
    %3 = vector.load %arg3[%c0_3, %c0_4] : memref<1x8xf32, #tpu.memory_space<vmem>>, vector<1x8xf32>
    %4 = vector.broadcast %3 : vector<1x8xf32> to vector<8x8xf32>
    %5 = arith.addf %2, %4 : vector<8x8xf32>
    %6 = math.sin %5 : vector<8x8xf32>
    %cst_5 = arith.constant 0.000000e+00 : f32
    %7 = vector.broadcast %cst_5 : f32 to vector<8x8xf32>
    %8 = arith.cmpf ogt, %6, %7 : vector<8x8xf32>
    %cst_6 = arith.constant 0.000000e+00 : f32
    %9 = vector.broadcast %cst_6 : f32 to vector<8x8xf32>
    %10 = arith.cmpf olt, %6, %9 : vector<8x8xf32>
    %cst_7 = arith.constant -1.000000e+00 : f32
    %cst_8 = arith.constant 0.000000e+00 : f32
    %11 = vector.broadcast %cst_7 : f32 to vector<8x8xf32>
    %12 = vector.broadcast %cst_8 : f32 to vector<8x8xf32>
    %13 = arith.select %10, %11, %12 : vector<8x8xi1>, vector<8x8xf32>
    %cst_9 = arith.constant 1.000000e+00 : f32
    %14 = vector.broadcast %cst_9 : f32 to vector<8x8xf32>
    %15 = arith.select %8, %14, %13 : vector<8x8xi1>, vector<8x8xf32>
    %c0_10 = arith.constant 0 : index
    %c0_11 = arith.constant 0 : index
    %16 = vector.load %arg4[%c0_10, %c0_11] : memref<1x8xi32, #tpu.memory_space<vmem>>, vector<1x8xi32>
    %c0_i32 = arith.constant 0 : i32
    %17 = vector.broadcast %c0_i32 : i32 to vector<1x8xi32>
    %18 = arith.cmpi eq, %16, %17 : vector<1x8xi32>
    %c1_i32 = arith.constant 1 : i32
    %19 = vector.broadcast %c1_i32 : i32 to vector<1x8xi32>
    %20 = arith.cmpi eq, %16, %19 : vector<1x8xi32>
    %21 = vector.shape_cast %20 : vector<1x8xi1> to vector<1x8xi1>
    %22 = vector.broadcast %21 : vector<1x8xi1> to vector<8x8xi1>
    %23 = arith.select %22, %6, %15 : vector<8x8xi1>, vector<8x8xf32>
    %24 = vector.shape_cast %18 : vector<1x8xi1> to vector<1x8xi1>
    %25 = vector.broadcast %24 : vector<1x8xi1> to vector<8x8xi1>
    %26 = arith.select %25, %5, %23 : vector<8x8xi1>, vector<8x8xf32>
    %c0_12 = arith.constant 0 : index
    %c0_13 = arith.constant 0 : index
    %27 = vector.load %arg5[%c0_12, %c0_13] : memref<8x8xf32, #tpu.memory_space<vmem>>, vector<8x8xf32>
    tpu.vector_store %arg5[%c0_12, %c0_13], %26 {strides = array<i32>} : memref<8x8xf32, #tpu.memory_space<vmem>>, vector<8x8xf32>,
    return
  }
  func.func @transform_0(%arg0: i32) -> (i32, i32) {
    %c0_i32 = arith.constant 0 : i32
    %c0_i32_0 = arith.constant 0 : i32
    return %arg0, %c0_i32 : i32, i32
  }
  func.func @transform_1(%arg0: i32) -> (i32, i32) {
    %c0_i32 = arith.constant 0 : i32
    %c0_i32_0 = arith.constant 0 : i32
    %c0_i32_1 = arith.constant 0 : i32
    return %c0_i32, %c0_i32_0 : i32, i32
  }
  func.func @transform_2(%arg0: i32) -> (i32, i32) {
    %c0_i32 = arith.constant 0 : i32
    %c0_i32_0 = arith.constant 0 : i32
    %c0_i32_1 = arith.constant 0 : i32
    return %c0_i32, %c0_i32_0 : i32, i32
  }
  func.func @transform_3(%arg0: i32) -> (i32, i32) {
    %c0_i32 = arith.constant 0 : i32
    %c0_i32_0 = arith.constant 0 : i32
    %c0_i32_1 = arith.constant 0 : i32
    return %c0_i32, %c0_i32_0 : i32, i32
  }
  func.func @transform_4(%arg0: i32) -> (i32, i32) {
    %c0_i32 = arith.constant 0 : i32
    %c0_i32_0 = arith.constant 0 : i32
    return %arg0, %c0_i32 : i32, i32
  }
}

</mosaic_0001>

<bundles_post_ra>
// kernel: tpu_custom_call.1
= control target key start
LH: loop header
LB: loop body
LE: loop exit
PB: predicated region body
PF: predicated region fallthrough
CT: control target
= control target key end

     0   :  { %s969_s15 = smov 0   ;;  %s1043_s0 = inlined_call_operand.vmem [shape: f32[16,4], index: 0, kind: input, shape index: {}]   ;;  %s1044_s1 = inlined_call_operand.vmem [shape: f32[4,8], index: 1, kind: input, shape index: {}]   ;;  %s1045_s2 = inlined_call_operand.vmem [shape: f32[1,8], index: 2, kind: input, shape index: {}]   ;;  %s1046_s3 = inlined_call_operand.vmem [shape: s32[1,8], index: 3, kind: input, shape index: {}]   ;;  %s1047_s4 = inlined_call_operand.vmem [shape: f32[16,8], index: 4, kind: output, shape index: {}]  }
   0x1 LB: > { %s836_s16 = sadd.s32 4294967295, %s933_s15   ;;  %p840_p0 = scmp.ge.s32.totalorder %s933_s15, 1  ;;  %s933_s15 = sphi %s969_s15, %s14_s15  }
   0x2   : > { %p161_p1 = scmp.lt.s32.totalorder %s933_s15, 3 }
   0x4   : > { %p162_p2 = pnand %p840_p0, %p161_p1 }
   0x5   : > { %v194_v0 = vld [vmem:[%s1044_s1] sm:$0xf] (!%p162_p2)  ;;  %vm206_vm0 = vcmask (!%p162_p2), 1043456   ;;  %p185_p3 = scmp.lt.s32.totalorder (!%p162_p2), %s836_s16, 1  ;;  %v935_v1 = vmov (!%p162_p2), 0.0   ;;  %vm936_vm1 = vmmov (!%p162_p2), 0  }
   0x6   : > { %165 = sbr.rel (%p162_p2) target bundleno = 345 (0x159), region = 36  ;;  %877 = vmatprep.subr.mxu0 (!%p162_p2), %v935_v1  ;;  %v208_v2 = vsel (!%p162_p2), %vm206_vm0, %v194_v0, 0  ;;  %879 = vmatprep.mubr.msk.f32.mxu0 (!%p162_p2), %vm936_vm1, %v935_v1  ;;  %vm202_vm2 = vcmask (!%p162_p2), 31744   ;;  %v843_v17 = vld [vmem:[%s1045_s2] ss:$0 sm:$0xff] (!%p162_p2) }
   0x7   : > { %v211_v3 = vand.u32 (!%p162_p2), 4294901760, %v208_v2  ;;  %862 = vmatprep.subr.mxu1 (!%p162_p2), %v935_v1  ;;  %864 = vmatprep.mubr.msk.f32.mxu1 (!%p162_p2), %vm936_vm1, %v935_v1  ;;  %v937_v32 = vmov (!%p162_p2), 683565275   ;;  %v938_v34 = vmov (!%p162_p2), 2475754826  }
   0x8   : > { %v939_v37 = vmov (!%p162_p2), 2131351028   ;;  %v940_v40 = vmov (!%p162_p2), 2102212464   ;;  %v941_v43 = vmov (!%p162_p2), 920167782  }
   0x9   : > { %v288_v4 = vsub.f32 (!%p162_p2), %v208_v2, %v211_v3  ;;  %878 = vmatpush3.msra.mxu0 (!%p162_p2), %v211_v3  ;;  %863 = vmatpush3.msra.mxu1 (!%p162_p2), %v211_v3  ;;  %v942_v46 = vmov (!%p162_p2), 1326507024  }
   0xa   : > { %867 = vmatprep.subr.mxu1 (!%p162_p2), %v935_v1  ;;  %882 = vmatprep.subr.mxu0 (!%p162_p2), %v935_v1 }
   0xb   : > { %v289_v7 = vand.u32 (!%p162_p2), 4294901760, %v288_v4 }
   0xd   : > { %s1049_s16 = smov (!%p185_p3, %s836_s16), 1  ;;  %v290_v10 = vsub.f32 %v288_v4, %v289_v7 }
   0xe   : > { %s841_s19 = sshll.u32 %s1049_s16, 3 }
   0xf   : > { %s188_s22 = scalar_lea.vmem %s1043_s0, %s841_s19  ;;  %v291_v13 = vand.u32 4294901760, %v290_v10  ;;  %s192_s29 = scalar_lea.vmem %s1047_s4, %s841_s19 }
  0x10   : > { %v193_v5 = vld [vmem:[%s188_s22] sm:$0xff] }
  0x11   : > { %v204_v6 = vsel %vm202_vm2, %v193_v5, 0 }
  0x12   : > { %v276_v8 = vand.u32 4294901760, %v204_v6 }
  0x14   : > { %v277_v9 = vsub.f32 %v204_v6, %v276_v8 }
  0x16   : > { %v278_v11 = vand.u32 4294901760, %v277_v9 }
  0x18   : > { %880 = vmatmul.mubr.f32.vlgmr.msra.gmra.mrb[0].mxu0 %v278_v11  ;;  %v279_v12 = vsub.f32 %v277_v9, %v278_v11 }
  0x19   : > { %883 = vmatpush3.msra.mxu0 %v289_v7  ;;  %884 = vmatprep.mubr.msk.f32.mxu0 %vm936_vm1, %v935_v1 }
  0x1a   : > { %v280_v14 = vand.u32 4294901760, %v279_v12  ;;  %887 = vmatprep.subr.mxu0 %v935_v1 }
  0x1c   : > { %865 = vmatmul.mubr.f32.vlgmr.msra.gmra.mrb[0].mxu1 %v280_v14 }
  0x1d   : > { %868 = vmatpush3.msra.mxu1 %v291_v13  ;;  %869 = vmatprep.mubr.msk.f32.mxu1 %vm936_vm1, %v935_v1 }
  0x1e   : > { %872 = vmatprep.subr.mxu1 %v935_v1 }
  0x20   : > { %885 = vmatmul.mubr.f32.vlgmr.msra.gmra.mrb[0].mxu0 %v276_v8 }
  0x21   : > { %888 = vmatpush3.msra.mxu0 %v211_v3  ;;  %889 = vmatprep.mubr.msk.f32.mxu0 %vm936_vm1, %v935_v1 }
  0x24   : > { %870 = vmatmul.mubr.f32.vlgmr.msra.gmra.mrb[0].mxu1 %v276_v8 }
  0x25   : > { %873 = vmatpush3.msra.mxu1 %v288_v4  ;;  %874 = vmatprep.mubr.msk.f32.mxu1 %vm936_vm1, %v935_v1 }
  0x28   : > { %890 = vmatmul.mubr.f32.vlgmr.msra.gmra.mrb[0].mxu0 %v276_v8 }
  0x2c   : > { %875 = vmatmul.mubr.f32.vlgmr.msra.gmra.mrb[0].mxu1 %v277_v9 }
  0xfb   : > { %v652_v15 = vpop.f32.mrb[0].mxu0 }
  0xfc   : > { %v891_v16 = vpop.f32.mrb[1].mxu0 }
  0xff   : > { %v432_v18 = vpop.f32.mrb[0].mxu1 }
 0x100   : > { %v892_v19 = vadd.f32 %v843_v17, %v432_v18  ;;  %v876_v20 = vpop.f32.mrb[1].mxu1 }
 0x102   : > { %v1009_v21 = vadd.f32 %v892_v19, %v652_v15 }
 0x104   : > { %v659_v22 = vand.u32 2139095040, %v1009_v21  ;;  %v656_v26 = vand.u32 2147483647, %v1009_v21  ;;  %vm658_vm10 = vcmp.lt.s32.totalorder %v1009_v21, 0  ;;  %vm748_vm1 = vweird.f32 %v1009_v21 }
 0x106   : > { %v660_v23 = vshrl.u32 %v659_v22, 23  ;;  %v663_v29 = vand.u32 8388607, %v656_v26  ;;  %vm657_vm11 = vcmp.le.f32.partialorder %v656_v26, 0.7853982  ;;  %v943_v26 = vmov 0  }
 0x108   : > { %v844_v24 = vadd.s32 4294967169, %v660_v23  ;;  %v664_v48 = vor.u32 8388608, %v663_v29 }
 0x10a   : > { %v666_v25 = vadd.s32 1, %v844_v24  ;;  %v704_v62 = vshll.u32 %v664_v48, 8 }
 0x10c   : > { %vm667_vm3 = vcmp.gt.s32.totalorder %v666_v25, 0 }
 0x10d   : > { %v668_v27 = vsel %vm667_vm3, %v666_v25, 0 }
 0x10e   : > { %v670_v28 = vand.u32 31, %v668_v27  ;;  %v669_v31 = vshrl.u32 %v668_v27, 5 }
 0x110   : > { %v671_v30 = vsub.s32 32, %v670_v28  ;;  %v673_v33 = vshll.u32 %v937_v32, %v670_v28  ;;  %v676_v35 = vshll.u32 %v938_v34, %v670_v28  ;;  %v679_v39 = vshll.u32 %v939_v37, %v670_v28 }
 0x111   : > { %v682_v42 = vshll.u32 %v940_v40, %v670_v28  ;;  %v685_v45 = vshll.u32 %v941_v43, %v670_v28  ;;  %vm688_vm4 = vcmp.lt.s32.totalorder %v669_v31, 1  ;;  %vm691_vm5 = vcmp.lt.s32.totalorder %v669_v31, 4 }
 0x112   : > { %v674_v36 = vshrl.u32 %v938_v34, %v671_v30  ;;  %v677_v38 = vshrl.u32 %v939_v37, %v671_v30  ;;  %v680_v41 = vshrl.u32 %v940_v40, %v671_v30  ;;  %v683_v44 = vshrl.u32 %v941_v43, %v671_v30 }
 0x113   : > { %v686_v47 = vshrl.u32 %v942_v46, %v671_v30  ;;  %v672_v57 = vshrl.u32 %v937_v32, %v671_v30  ;;  %vm690_vm6 = vcmp.lt.s32.totalorder %v669_v31, 3  ;;  %vm689_vm7 = vcmp.lt.s32.totalorder %v669_v31, 2 }
 0x114   : > { %v675_v49 = vor.u32 %v674_v36, %v673_v33  ;;  %v678_v50 = vor.u32 %v677_v38, %v676_v35  ;;  %v681_v51 = vor.u32 %v680_v41, %v679_v39  ;;  %v684_v52 = vor.u32 %v683_v44, %v682_v42  ;;  %v764_v44 = vld [vmem:[%s1046_s3] sm:$0x1] }
 0x115   : > { %v687_v53 = vor.u32 %v686_v47, %v685_v45  ;;  %v768_v42 = vlaneseq  ;;  %vm766_vm12 = vcmp.eq.s32.totalorder %v764_v44, 1  ;;  %vm765_vm13 = vcmp.eq.s32.totalorder %v764_v44, 0 }
 0x116   : > { %v693_v54 = vsel %vm691_vm5, %v681_v51, 2102212464  ;;  %v696_v55 = vsel %vm688_vm4, %v675_v49, %v678_v50  ;;  %v700_v56 = vsel %vm688_vm4, %v678_v50, %v681_v51  ;;  %v697_v58 = vsel %vm691_vm5, %v684_v52, 920167782 }
 0x117   : > { %v701_v59 = vsel %vm691_vm5, %v687_v53, 1326507024  ;;  %v698_v60 = vsel %vm690_vm6, %v681_v51, %v697_v58  ;;  %v692_v63 = vsel %vm688_vm4, %v672_v57, %v675_v49  ;;  %v694_v0 = vsel %vm690_vm6, %v678_v50, %v693_v54 }
 0x118   : > { %v702_v61 = vsel %vm690_vm6, %v684_v52, %v701_v59  ;;  %v699_v2 = vsel %vm689_vm7, %v696_v55, %v698_v60  ;;  %v695_v8 = vsel %vm689_vm7, %v692_v63, %v694_v0  ;;  %v769_v45 = vshrl.u32 %v768_v42, 7 }
 0x119   : > { %v703_v3 = vsel %vm689_vm7, %v700_v56, %v702_v61  ;;  %v1018_v6 = vmul.u32.u64.low %v704_v62, %v699_v2  ;;  %v1019_v7 = vmul.u32.u64.high %v704_v62, %v699_v2, %v1018_v6  ;;  %v711_v10 = vmul.u32 %v704_v62, %v695_v8 }
 0x11a   : > { %v1015_v4 = vmul.u32.u64.low %v704_v62, %v703_v3  ;;  %v1016_v5 = vmul.u32.u64.high %v704_v62, %v703_v3, %v1015_v4  ;;  %v770_v47 = vsub.s32 0, %v769_v45  ;;  %v767_v49 = vsel %vm766_vm12, 1, %v943_v26 }
 0x11b   : > { %v714_v9 = vadd.s32 1, %v1019_v7  ;;  %v774_v52 = vsel %vm765_vm13, 1, %v943_v26  ;;  %vm781_vm6 = vcmask 64512  }
 0x11c   : > { %vm713_vm8 = vc.u32 %v1016_v5, %v1018_v6  ;;  %v712_v23 = vadd.s32 %v1018_v6, %v1016_v5  ;;  %v771_v55 = vrot.slane %v767_v49, %v770_v47  ;;  %v778_v57 = vrot.slane %v774_v52, %v770_v47 }
 0x11d   : > { %v715_v11 = vsel %vm713_vm8, %v714_v9, %v1019_v7 }
 0x11e   : > { %v716_v12 = vadd.s32 %v715_v11, %v711_v10  ;;  %vm772_vm4 = vcmp.eq.s32.totalorder %v771_v55, 1  ;;  %vm779_vm5 = vcmp.eq.s32.totalorder %v778_v57, 1 }
 0x120   : > { %v717_v13 = vadd.s32 536870912, %v716_v12 }
 0x122   : > { %v718_v14 = vshrl.u32 %v717_v13, 30 }
 0x124   : > { %v719_v15 = vshll.u32 %v718_v14, 30  ;;  %v742_v36 = vsub.s32 4, %v718_v14 }
 0x126   : > { %v720_v16 = vsub.s32 %v716_v12, %v719_v15  ;;  %v743_v39 = vsel %vm658_vm10, %v742_v36, %v718_v14 }
 0x127   : > { %v745_v41 = vsel %vm657_vm11, 0, %v743_v39 }
 0x128   : > { %v722_v17 = vsub.s32 0, %v720_v16  ;;  %v749_v43 = vadd.s32 3, %v745_v41 }
 0x12a   : > { %v845_v18 = vmin.u32 %v722_v17, %v720_v16  ;;  %v750_v46 = vand.u32 3, %v749_v43 }
 0x12c   : > { %v724_v19 = vclz %v845_v18  ;;  %vm755_vm14 = vcmp.eq.s32.totalorder %v750_v46, 2  ;;  %vm752_vm15 = vcmp.eq.s32.totalorder %v750_v46, 0  ;;  %vm751_vm0 = vcmp.lt.s32.totalorder %v750_v46, 2 }
 0x12e   : > { %v846_v20 = vadd.s32 4294967294, %v724_v19 }
 0x130   : > { %vm847_vm9 = vcmp.lt.s32.totalorder %v846_v20, 0 }
 0x131   : > { %v727_v22 = vsel %vm847_vm9, 0, %v846_v20 }
 0x132   : > { %v728_v24 = vsub.s32 32, %v727_v22  ;;  %v732_v25 = vsub.s32 4294967266, %v727_v22  ;;  %v729_v27 = vshll.u32 %v720_v16, %v727_v22 }
 0x134   : > { %v730_v28 = vshrl.u32 %v712_v23, %v728_v24  ;;  %v733_v29 = vadd.s32 127, %v732_v25 }
 0x136   : > { %v731_v30 = vor.u32 %v730_v28, %v729_v27  ;;  %v734_v31 = vshll.u32 %v733_v29, 23 }
 0x138   : > { %v735_v32 = vor.u32 4788187, %v734_v31  ;;  %v738_v34 = vcvt.s32.f32 %v731_v30 }
 0x13a   : > { %v736_v33 = vand.u32 2147483647, %v735_v32 }
 0x13c   : > { %v739_v35 = vmul.f32 %v738_v34, %v736_v33 }
 0x13e   : > { %v740_v37 = vxor.u32 2147483648, %v739_v35 }
 0x140   : > { %v741_v38 = vsel %vm658_vm10, %v740_v37, %v739_v35 }
 0x141   : > { %v744_v40 = vsel %vm657_vm11, %v1009_v21, %v741_v38 }
 0x142   : > { %923 = vcosq.f32 %v744_v40 }
 0x143   : > { %925 = vsinq.f32 %v744_v40 }
 0x14c   : > { %v924_v48 = vpop.eup %923 }
 0x14d   : > { %v926_v50 = vpop.eup %925  ;;  %v756_v51 = vxor.u32 2147483648, %v924_v48 }
 0x14e   : > { %v753_v53 = vxor.u32 2147483648, %v926_v50 }
 0x14f   : > { %v757_v54 = vsel %vm755_vm14, %v756_v51, %v926_v50 }
 0x150   : > { %v754_v56 = vsel %vm752_vm15, %v924_v48, %v753_v53 }
 0x151   : > { %v758_v58 = vsel %vm751_vm0, %v754_v56, %v757_v54 }
 0x152   : > { %v759_v59 = vsel %vm748_vm1, nan, %v758_v58 }
 0x153   : > { %vm760_vm2 = vcmp.gt.f32.partialorder %v759_v59, 0.0  ;;  %vm761_vm3 = vcmp.lt.f32.partialorder %v759_v59, 0.0 }
 0x154   : > { %v762_v60 = vsel %vm761_vm3, -1.0, %v935_v1 }
 0x155   : > { %v763_v61 = vsel %vm760_vm2, 1.0, %v762_v60 }
 0x156   : > { %v773_v62 = vsel %vm772_vm4, %v759_v59, %v763_v61 }
 0x157   : > { %v780_v63 = vsel %vm779_vm5, %v1009_v21, %v773_v62 }
 0x158   : > { %782 = vst.msk [vmem:[%s192_s29] sm:$0xff] %vm781_vm6, %v780_v63 }
 0x159 PF: > { %s14_s15 = sadd.s32 1, %s933_s15  }
 0x15a   : > { %p11_p4 = scmp.ge.s32.totalorder %s14_s15, 4  }
 0x15c   :  { %13 = sbr.rel (!%p11_p4) target bundleno = 1 (0x1), region = 66 }

</bundles_post_ra>
